<compile_context>
chip_gen: v5e
topology: v5e:2x2
jax: 0.10.0
libtpu: 0.0.40
codegen_flags: <defaults>
</compile_context>

<pallas_src>
import functools

import jax
import jax.numpy as jnp
from jax import lax
from jax.experimental import pallas as pl
from jax.experimental.pallas import tpu as pltpu


def _round_up(x, m):
    return (x + m - 1) // m * m


def _cdiv(a, b):
    return -(-a // b)


def _conv_relu_pool_kernel(p_ref, w_ref, b_ref, o_ref, acc_ref, *, slope):
    # p_ref:   (1, 4, TM, TK) bf16 im2col rows, one group per 2x2 pool offset
    # w_ref:   (TK, Cp)       bf16 weights
    # b_ref:   (1, Cp)        f32 bias
    # o_ref:   (1, TM, Cp)    lane-dense output (Cp % 128 == 0 -> unmasked vst)
    # acc_ref: (4*TM, Cp)     f32 accumulator, resident across the K grid axis
    k = pl.program_id(2)
    tm = o_ref.shape[1]
    tk = w_ref.shape[0]

    @pl.when(k == 0)
    def _():
        acc_ref[...] = jnp.zeros_like(acc_ref)

    # One fused MXU matmul over all 4 pooling offsets (single vmatmul chain,
    # f32 accumulation).  The (4, TM, TK) -> (4*TM, TK) merge is sublane-
    # contiguous (TM % 16 == 0), so it is layout-free.
    p = p_ref[0].reshape(4 * tm, tk)
    acc_ref[...] += jnp.dot(p, w_ref[...], preferred_element_type=jnp.float32)

    @pl.when(k == pl.num_programs(2) - 1)
    def _():
        # MaxPool2d(2,2) = max over the 4 offsets.  Per-channel bias-add and
        # LeakyReLU (slope > 0) are monotone, so applying them after the max
        # is exactly conv -> bias -> LeakyReLU -> pool.
        y0 = acc_ref[pl.ds(0 * tm, tm), :]
        y1 = acc_ref[pl.ds(1 * tm, tm), :]
        y2 = acc_ref[pl.ds(2 * tm, tm), :]
        y3 = acc_ref[pl.ds(3 * tm, tm), :]
        m = jnp.maximum(jnp.maximum(y0, y1), jnp.maximum(y2, y3)) + b_ref[...]
        m = jnp.maximum(m, slope * m)          # LeakyReLU, exact for 0<slope<1
        o_ref[0] = m.astype(o_ref.dtype)


def conv_relu_pool(x_nchw, weight, bias, *, negative_slope=0.2):
    """x_nchw: (N, C_in, H, W); weight: (C_out, C_in, 4, 4); bias: (C_out,)."""
    N, C_in, H, W = x_nchw.shape
    C_out = weight.shape[0]
    kh = kw = 4
    stride, pad = 2, 1
    H_out = (H + 2 * pad - kh) // stride + 1
    W_out = (W + 2 * pad - kw) // stride + 1
    Hp, Wp = H_out // 2, W_out // 2       # MaxPool2d(2,2) (floor) output size
    K = kh * kw * C_in
    M = Hp * Wp                           # pooled pixels per image
    out_dtype = x_nchw.dtype
    out_esize = jnp.dtype(out_dtype).itemsize

    # ---- lane padding / K tiling -------------------------------------------
    Cp = _round_up(C_out, 128)
    # Do NOT pad K to 128 for small C_in (K = 16*C_in is always a multiple of
    # 16 and a full-array-dim block is legal) -- avoids zero-work on early
    # layers.  Large K is tiled (<=2048 per step) over an "arbitrary" grid axis.
    MAX_TK = 2048
    if K < 128:
        nk, TK = 1, K
    else:
        K128 = _round_up(K, 128)
        nk = _cdiv(K128, MAX_TK)
        TK = _round_up(_cdiv(K128, nk), 128)
    Kp = nk * TK

    # ---- VMEM-capacity-driven row tile --------------------------------------
    try:
        vmem_capacity = int(pltpu.get_tpu_info().vmem_capacity_bytes)
    except Exception:
        vmem_capacity = 64 << 20          # conservative fallback (v7x per-core)
    budget = vmem_capacity * 3 // 4       # headroom for compiler scratch
    # bytes independent of TM: weight + bias (counted double-buffered, safe)
    fixed = 2 * TK * Cp * 2 + 2 * Cp * 4
    # bytes per output row: patches (bf16, x2 bufs) + out (x2 bufs) + f32 acc
    per_row = 2 * 4 * TK * 2 + 2 * Cp * out_esize + 4 * Cp * 4
    tm_cap = (budget - fixed) // per_row
    tm_cap = max(16, min(1024, tm_cap)) // 16 * 16
    tm_cap = max(16, tm_cap)
    # pick TM minimizing Mp padding (avoid e.g. M=520 -> Mp=1024)
    n_row_tiles = _cdiv(M, tm_cap)
    TM = _round_up(_cdiv(M, n_row_tiles), 16)
    Mp = n_row_tiles * TM

    # ---- im2col via 16 strided slices, built in bf16 -------------------------
    x = jnp.transpose(x_nchw, (0, 2, 3, 1)).astype(jnp.bfloat16)   # NHWC
    x = jnp.pad(x, ((0, 0), (pad, pad), (pad, pad), (0, 0)))
    slabs = []
    for i in range(kh):
        for j in range(kw):
            slabs.append(lax.slice(
                x, (0, i, j, 0),
                (N, i + stride * (H_out - 1) + 1,
                 j + stride * (W_out - 1) + 1, C_in),
                (1, stride, stride, 1)))                 # (N, H_out, W_out, C_in)
    patches = jnp.concatenate(slabs, axis=-1)            # (N, H_out, W_out, K)
    # TODO(synk): build im2col in-kernel from the NHWC input (memory_space=
    # pl.ANY + manual make_async_copy of row strips) to avoid materializing the
    # ~16x-amplified patches stream in HBM.
    patches = patches[:, :2 * Hp, :2 * Wp, :]
    patches = patches.reshape(N, Hp, 2, Wp, 2, K)
    patches = jnp.transpose(patches, (0, 2, 4, 1, 3, 5)) # (N, dh, dw, Hp, Wp, K)
    patches = patches.reshape(N, 4, M, K)
    patches = jnp.pad(patches, ((0, 0), (0, 0), (0, Mp - M), (0, Kp - K)))

    # weight (C_out, C_in, kh, kw) -> (kh, kw, C_in, C_out) -> (K, C_out)
    w_mat = jnp.transpose(weight, (2, 3, 1, 0)).reshape(K, C_out)
    w_mat = jnp.pad(w_mat, ((0, Kp - K), (0, Cp - C_out))).astype(jnp.bfloat16)
    b_mat = jnp.pad(bias.reshape(1, C_out).astype(jnp.float32),
                    ((0, 0), (0, Cp - C_out)))

    used = fixed + per_row * TM
    vmem_limit = int(min(vmem_capacity * 15 // 16,
                         max(used * 5 // 4, 32 << 20)))

    kernel = functools.partial(_conv_relu_pool_kernel, slope=negative_slope)

    def build(single_buffer_invariants):
        def invariant_spec(shape, index_map):
            if single_buffer_invariants:
                return pl.BlockSpec(shape, index_map,
                                    pipeline_mode=pl.Buffered(1))
            return pl.BlockSpec(shape, index_map)

        # weight is grid-invariant only when K fits in a single step
        if nk == 1:
            w_spec = invariant_spec((TK, Cp), lambda n, m, k: (k, 0))
        else:
            w_spec = pl.BlockSpec((TK, Cp), lambda n, m, k: (k, 0))
        b_spec = invariant_spec((1, Cp), lambda n, m, k: (0, 0))

        # TODO(synk): for tiny N * n_row_tiles on v7x, add a Cp grid axis so
        # both TensorCores get work.
        return pl.pallas_call(
            kernel,
            out_shape=jax.ShapeDtypeStruct((N, Mp, Cp), out_dtype),
            grid_spec=pltpu.PrefetchScalarGridSpec(
                num_scalar_prefetch=0,
                grid=(N, n_row_tiles, nk),
                in_specs=[
                    pl.BlockSpec((1, 4, TM, TK), lambda n, m, k: (n, 0, m, k)),
                    w_spec,
                    b_spec,
                ],
                out_specs=pl.BlockSpec((1, TM, Cp), lambda n, m, k: (n, m, 0)),
                scratch_shapes=[pltpu.VMEM((4 * TM, Cp), jnp.float32)],
            ),
            compiler_params=pltpu.CompilerParams(
                dimension_semantics=("parallel", "parallel", "arbitrary"),
                vmem_limit_bytes=vmem_limit),
        )

    try:
        out = build(True)(patches, w_mat, b_mat)
    except Exception:
        # pl.Buffered(1) not supported on this jax/libtpu combo: fall back to
        # default double-buffering for the invariant blocks.
        out = build(False)(patches, w_mat, b_mat)

    # (N, Mp, Cp) -> crop padding -> NCHW (N, C_out, Hp, Wp)
    out = out[:, :M, :C_out].reshape(N, Hp, Wp, C_out)
    return jnp.transpose(out, (0, 3, 1, 2))


def _reference(x, weight, bias, negative_slope=0.2):
    y = lax.conv_general_dilated(
        x, weight, window_strides=(2, 2), padding=((1, 1), (1, 1)),
        dimension_numbers=("NCHW", "OIHW", "NCHW"))
    y = y + bias[None, :, None, None]
    y = jnp.where(y > 0, y, negative_slope * y)
    return lax.reduce_window(y, -jnp.inf, lax.max,
                             (1, 1, 2, 2), (1, 1, 2, 2), "VALID")


if __name__ == "__main__":
    key = jax.random.PRNGKey(0)
    kx, kw_, kb = jax.random.split(key, 3)

    N, in_dim, H, W = 2, 4, 16, 16
    out_dim = 8

    x = jax.random.normal(kx, (N, in_dim, H, W), dtype=jnp.float32)
    # deterministic synthetic params (Conv2d(in_dim, out_dim, 4, 2, 1) shapes)
    weight = 0.1 * jax.random.normal(kw_, (out_dim, in_dim, 4, 4), dtype=jnp.float32)
    bias = 0.1 * jax.random.normal(kb, (out_dim,), dtype=jnp.float32)

    out = conv_relu_pool(x, weight, bias)
    out = jax.block_until_ready(out)

    ref = jax.block_until_ready(_reference(x, weight, bias))
    assert out.shape == (N, out_dim, H // 4, W // 4), out.shape
    # bf16 inputs with f32 accumulation -> loosened tolerance vs f32 reference.
    assert jnp.allclose(out, ref, atol=5e-2, rtol=5e-2), float(
        jnp.max(jnp.abs(out - ref)))

    print("KERNEL_OK")
</pallas_src>

<mosaic_0001>
module attributes {stable_mosaic.version = 11 : i64} {
  func.func @_conv_relu_pool_kernel(%arg0: i32, %arg1: i32, %arg2: i32, %arg3: memref<1x4x16x64xbf16, #tpu.memory_space<vmem>>, %arg4: memref<64x128xbf16, #tpu.memory_space<vmem>>, %arg5: memref<1x128xf32, #tpu.memory_space<vmem>>, %arg6: memref<1x16x128xf32, #tpu.memory_space<vmem>>, %arg7: memref<64x128xf32, #tpu.memory_space<vmem>>) attributes {dimension_semantics = [#tpu.dimension_semantics<parallel>, #tpu.dimension_semantics<parallel>, #tpu.dimension_semantics<arbitrary>], iteration_bounds = array<i64: 2, 1, 1>, scalar_prefetch = 0 : i64, scratch_operands = 1 : i64, tpu.core_type = #tpu.core_type<tc>, window_params = [{transform_indices = @transform_0, window_bounds = array<i64: 1, 4, 16, 64>}, {pipeline_mode = #tpu.pipeline_mode<synchronous>, transform_indices = @transform_1, window_bounds = array<i64: 64, 128>}, {pipeline_mode = #tpu.pipeline_mode<synchronous>, transform_indices = @transform_2, window_bounds = array<i64: 1, 128>}, {transform_indices = @transform_3, window_bounds = array<i64: 1, 16, 128>}]} {
    %c0_i32 = arith.constant 0 : i32
    %0 = arith.cmpi eq, %arg2, %c0_i32 : i32
    %1 = arith.extui %0 : i1 to i32
    %c0_i32_0 = arith.constant 0 : i32
    %2 = arith.cmpi ne, %1, %c0_i32_0 : i32
    scf.if %2 {
      %cst_12 = arith.constant 0.000000e+00 : f32
      %14 = vector.broadcast %cst_12 : f32 to vector<64x128xf32>
      %c0_13 = arith.constant 0 : index
      %c0_14 = arith.constant 0 : index
      %15 = vector.load %arg7[%c0_13, %c0_14] : memref<64x128xf32, #tpu.memory_space<vmem>>, vector<64x128xf32>
      tpu.vector_store %arg7[%c0_13, %c0_14], %14 {strides = array<i32>} : memref<64x128xf32, #tpu.memory_space<vmem>>, vector<64x128xf32>,
    } else {
    }
    %c0 = arith.constant 0 : index
    %c0_1 = arith.constant 0 : index
    %c0_2 = arith.constant 0 : index
    %c0_3 = arith.constant 0 : index
    %3 = vector.load %arg3[%c0, %c0_1, %c0_2, %c0_3] : memref<1x4x16x64xbf16, #tpu.memory_space<vmem>>, vector<1x4x16x64xbf16>
    %4 = vector.shape_cast %3 : vector<1x4x16x64xbf16> to vector<4x16x64xbf16>
    %5 = vector.shape_cast %4 : vector<4x16x64xbf16> to vector<64x64xbf16>
    %c0_4 = arith.constant 0 : index
    %c0_5 = arith.constant 0 : index
    %6 = vector.load %arg7[%c0_4, %c0_5] : memref<64x128xf32, #tpu.memory_space<vmem>>, vector<64x128xf32>
    %c0_6 = arith.constant 0 : index
    %c0_7 = arith.constant 0 : index
    %7 = vector.load %arg4[%c0_6, %c0_7] : memref<64x128xbf16, #tpu.memory_space<vmem>>, vector<64x128xbf16>
    %cst = arith.constant dense<0.000000e+00> : vector<64x128xf32>
    %8 = tpu.matmul %5, %7, %cst {dimension_numbers = #tpu.dot_dimension_numbers<[1], [0], [0], [1], [0, 0, 1, 1], [], []>} : vector<64x64xbf16>, vector<64x128xbf16>, vector<64x128xf32> -> vector<64x128xf32>
    %9 = arith.addf %6, %8 : vector<64x128xf32>
    %c0_8 = arith.constant 0 : index
    %c0_9 = arith.constant 0 : index
    %10 = vector.load %arg7[%c0_8, %c0_9] : memref<64x128xf32, #tpu.memory_space<vmem>>, vector<64x128xf32>
    tpu.vector_store %arg7[%c0_8, %c0_9], %9 {strides = array<i32>} : memref<64x128xf32, #tpu.memory_space<vmem>>, vector<64x128xf32>,
    %c0_i32_10 = arith.constant 0 : i32
    %11 = arith.cmpi eq, %arg2, %c0_i32_10 : i32
    %12 = arith.extui %11 : i1 to i32
    %c0_i32_11 = arith.constant 0 : i32
    %13 = arith.cmpi ne, %12, %c0_i32_11 : i32
    scf.if %13 {
      %c0_12 = arith.constant 0 : index
      %c0_13 = arith.constant 0 : index
      %14 = vector.load %arg7[%c0_12, %c0_13] : memref<64x128xf32, #tpu.memory_space<vmem>>, vector<16x128xf32>
      %c16 = arith.constant 16 : index
      %c0_14 = arith.constant 0 : index
      %15 = vector.load %arg7[%c16, %c0_14] : memref<64x128xf32, #tpu.memory_space<vmem>>, vector<16x128xf32>
      %c32 = arith.constant 32 : index
      %c0_15 = arith.constant 0 : index
      %16 = vector.load %arg7[%c32, %c0_15] : memref<64x128xf32, #tpu.memory_space<vmem>>, vector<16x128xf32>
      %c48 = arith.constant 48 : index
      %c0_16 = arith.constant 0 : index
      %17 = vector.load %arg7[%c48, %c0_16] : memref<64x128xf32, #tpu.memory_space<vmem>>, vector<16x128xf32>
      %18 = arith.maximumf %14, %15 : vector<16x128xf32>
      %19 = arith.maximumf %16, %17 : vector<16x128xf32>
      %20 = arith.maximumf %18, %19 : vector<16x128xf32>
      %c0_17 = arith.constant 0 : index
      %c0_18 = arith.constant 0 : index
      %21 = vector.load %arg5[%c0_17, %c0_18] : memref<1x128xf32, #tpu.memory_space<vmem>>, vector<1x128xf32>
      %22 = vector.broadcast %21 : vector<1x128xf32> to vector<16x128xf32>
      %23 = arith.addf %20, %22 : vector<16x128xf32>
      %cst_19 = arith.constant 2.000000e-01 : f32
      %24 = vector.broadcast %cst_19 : f32 to vector<16x128xf32>
      %25 = arith.mulf %24, %23 : vector<16x128xf32>
      %26 = arith.maximumf %23, %25 : vector<16x128xf32>
      %c0_20 = arith.constant 0 : index
      %c0_21 = arith.constant 0 : index
      %c0_22 = arith.constant 0 : index
      %27 = vector.load %arg6[%c0_20, %c0_21, %c0_22] : memref<1x16x128xf32, #tpu.memory_space<vmem>>, vector<1x16x128xf32>
      %28 = vector.shape_cast %27 : vector<1x16x128xf32> to vector<16x128xf32>
      %29 = vector.shape_cast %26 : vector<16x128xf32> to vector<1x16x128xf32>
      tpu.vector_store %arg6[%c0_20, %c0_21, %c0_22], %29 {strides = array<i32>} : memref<1x16x128xf32, #tpu.memory_space<vmem>>, vector<1x16x128xf32>,
    } else {
    }
    return
  }
  func.func @transform_0(%arg0: i32, %arg1: i32, %arg2: i32) -> (i32, i32, i32, i32) {
    %c0_i32 = arith.constant 0 : i32
    %c0_i32_0 = arith.constant 0 : i32
    return %arg0, %c0_i32, %arg1, %arg2 : i32, i32, i32, i32
  }
  func.func @transform_1(%arg0: i32, %arg1: i32, %arg2: i32) -> (i32, i32) {
    %c0_i32 = arith.constant 0 : i32
    %c0_i32_0 = arith.constant 0 : i32
    return %arg2, %c0_i32 : i32, i32
  }
  func.func @transform_2(%arg0: i32, %arg1: i32, %arg2: i32) -> (i32, i32) {
    %c0_i32 = arith.constant 0 : i32
    %c0_i32_0 = arith.constant 0 : i32
    %c0_i32_1 = arith.constant 0 : i32
    return %c0_i32, %c0_i32_0 : i32, i32
  }
  func.func @transform_3(%arg0: i32, %arg1: i32, %arg2: i32) -> (i32, i32, i32) {
    %c0_i32 = arith.constant 0 : i32
    %c0_i32_0 = arith.constant 0 : i32
    return %arg0, %arg1, %c0_i32 : i32, i32, i32
  }
}

module attributes {stable_mosaic.version = 11 : i64} {
  func.func @_conv_relu_pool_kernel(%arg0: i32, %arg1: i32, %arg2: i32, %arg3: memref<1x4x16x64xbf16, #tpu.memory_space<vmem>>, %arg4: memref<64x128xbf16, #tpu.memory_space<vmem>>, %arg5: memref<1x128xf32, #tpu.memory_space<vmem>>, %arg6: memref<1x16x128xf32, #tpu.memory_space<vmem>>, %arg7: memref<64x128xf32, #tpu.memory_space<vmem>>) attributes {dimension_semantics = [#tpu.dimension_semantics<parallel>, #tpu.dimension_semantics<parallel>, #tpu.dimension_semantics<arbitrary>], iteration_bounds = array<i64: 2, 1, 1>, scalar_prefetch = 0 : i64, scratch_operands = 1 : i64, tpu.core_type = #tpu.core_type<tc>, window_params = [{transform_indices = @transform_0, window_bounds = array<i64: 1, 4, 16, 64>}, {transform_indices = @transform_1, window_bounds = array<i64: 64, 128>}, {pipeline_mode = #tpu.pipeline_mode<synchronous>, transform_indices = @transform_2, window_bounds = array<i64: 1, 128>}, {transform_indices = @transform_3, window_bounds = array<i64: 1, 16, 128>}]} {
    %c0_i32 = arith.constant 0 : i32
    %0 = arith.cmpi eq, %arg2, %c0_i32 : i32
    %1 = arith.extui %0 : i1 to i32
    %c0_i32_0 = arith.constant 0 : i32
    %2 = arith.cmpi ne, %1, %c0_i32_0 : i32
    scf.if %2 {
      %cst_12 = arith.constant 0.000000e+00 : f32
      %14 = vector.broadcast %cst_12 : f32 to vector<64x128xf32>
      %c0_13 = arith.constant 0 : index
      %c0_14 = arith.constant 0 : index
      %15 = vector.load %arg7[%c0_13, %c0_14] : memref<64x128xf32, #tpu.memory_space<vmem>>, vector<64x128xf32>
      tpu.vector_store %arg7[%c0_13, %c0_14], %14 {strides = array<i32>} : memref<64x128xf32, #tpu.memory_space<vmem>>, vector<64x128xf32>,
    } else {
    }
    %c0 = arith.constant 0 : index
    %c0_1 = arith.constant 0 : index
    %c0_2 = arith.constant 0 : index
    %c0_3 = arith.constant 0 : index
    %3 = vector.load %arg3[%c0, %c0_1, %c0_2, %c0_3] : memref<1x4x16x64xbf16, #tpu.memory_space<vmem>>, vector<1x4x16x64xbf16>
    %4 = vector.shape_cast %3 : vector<1x4x16x64xbf16> to vector<4x16x64xbf16>
    %5 = vector.shape_cast %4 : vector<4x16x64xbf16> to vector<64x64xbf16>
    %c0_4 = arith.constant 0 : index
    %c0_5 = arith.constant 0 : index
    %6 = vector.load %arg7[%c0_4, %c0_5] : memref<64x128xf32, #tpu.memory_space<vmem>>, vector<64x128xf32>
    %c0_6 = arith.constant 0 : index
    %c0_7 = arith.constant 0 : index
    %7 = vector.load %arg4[%c0_6, %c0_7] : memref<64x128xbf16, #tpu.memory_space<vmem>>, vector<64x128xbf16>
    %cst = arith.constant dense<0.000000e+00> : vector<64x128xf32>
    %8 = tpu.matmul %5, %7, %cst {dimension_numbers = #tpu.dot_dimension_numbers<[1], [0], [0], [1], [0, 0, 1, 1], [], []>} : vector<64x64xbf16>, vector<64x128xbf16>, vector<64x128xf32> -> vector<64x128xf32>
    %9 = arith.addf %6, %8 : vector<64x128xf32>
    %c0_8 = arith.constant 0 : index
    %c0_9 = arith.constant 0 : index
    %10 = vector.load %arg7[%c0_8, %c0_9] : memref<64x128xf32, #tpu.memory_space<vmem>>, vector<64x128xf32>
    tpu.vector_store %arg7[%c0_8, %c0_9], %9 {strides = array<i32>} : memref<64x128xf32, #tpu.memory_space<vmem>>, vector<64x128xf32>,
    %c0_i32_10 = arith.constant 0 : i32
    %11 = arith.cmpi eq, %arg2, %c0_i32_10 : i32
    %12 = arith.extui %11 : i1 to i32
    %c0_i32_11 = arith.constant 0 : i32
    %13 = arith.cmpi ne, %12, %c0_i32_11 : i32
    scf.if %13 {
      %c0_12 = arith.constant 0 : index
      %c0_13 = arith.constant 0 : index
      %14 = vector.load %arg7[%c0_12, %c0_13] : memref<64x128xf32, #tpu.memory_space<vmem>>, vector<16x128xf32>
      %c16 = arith.constant 16 : index
      %c0_14 = arith.constant 0 : index
      %15 = vector.load %arg7[%c16, %c0_14] : memref<64x128xf32, #tpu.memory_space<vmem>>, vector<16x128xf32>
      %c32 = arith.constant 32 : index
      %c0_15 = arith.constant 0 : index
      %16 = vector.load %arg7[%c32, %c0_15] : memref<64x128xf32, #tpu.memory_space<vmem>>, vector<16x128xf32>
      %c48 = arith.constant 48 : index
      %c0_16 = arith.constant 0 : index
      %17 = vector.load %arg7[%c48, %c0_16] : memref<64x128xf32, #tpu.memory_space<vmem>>, vector<16x128xf32>
      %18 = arith.maximumf %14, %15 : vector<16x128xf32>
      %19 = arith.maximumf %16, %17 : vector<16x128xf32>
      %20 = arith.maximumf %18, %19 : vector<16x128xf32>
      %c0_17 = arith.constant 0 : index
      %c0_18 = arith.constant 0 : index
      %21 = vector.load %arg5[%c0_17, %c0_18] : memref<1x128xf32, #tpu.memory_space<vmem>>, vector<1x128xf32>
      %22 = vector.broadcast %21 : vector<1x128xf32> to vector<16x128xf32>
      %23 = arith.addf %20, %22 : vector<16x128xf32>
      %cst_19 = arith.constant 2.000000e-01 : f32
      %24 = vector.broadcast %cst_19 : f32 to vector<16x128xf32>
      %25 = arith.mulf %24, %23 : vector<16x128xf32>
      %26 = arith.maximumf %23, %25 : vector<16x128xf32>
      %c0_20 = arith.constant 0 : index
      %c0_21 = arith.constant 0 : index
      %c0_22 = arith.constant 0 : index
      %27 = vector.load %arg6[%c0_20, %c0_21, %c0_22] : memref<1x16x128xf32, #tpu.memory_space<vmem>>, vector<1x16x128xf32>
      %28 = vector.shape_cast %27 : vector<1x16x128xf32> to vector<16x128xf32>
      %29 = vector.shape_cast %26 : vector<16x128xf32> to vector<1x16x128xf32>
      tpu.vector_store %arg6[%c0_20, %c0_21, %c0_22], %29 {strides = array<i32>} : memref<1x16x128xf32, #tpu.memory_space<vmem>>, vector<1x16x128xf32>,
    } else {
    }
    return
  }
  func.func @transform_0(%arg0: i32, %arg1: i32, %arg2: i32) -> (i32, i32, i32, i32) {
    %c0_i32 = arith.constant 0 : i32
    %c0_i32_0 = arith.constant 0 : i32
    return %arg0, %c0_i32, %arg1, %arg2 : i32, i32, i32, i32
  }
  func.func @transform_1(%arg0: i32, %arg1: i32, %arg2: i32) -> (i32, i32) {
    %c0_i32 = arith.constant 0 : i32
    %c0_i32_0 = arith.constant 0 : i32
    return %arg2, %c0_i32 : i32, i32
  }
  func.func @transform_2(%arg0: i32, %arg1: i32, %arg2: i32) -> (i32, i32) {
    %c0_i32 = arith.constant 0 : i32
    %c0_i32_0 = arith.constant 0 : i32
    %c0_i32_1 = arith.constant 0 : i32
    return %c0_i32, %c0_i32_0 : i32, i32
  }
  func.func @transform_3(%arg0: i32, %arg1: i32, %arg2: i32) -> (i32, i32, i32) {
    %c0_i32 = arith.constant 0 : i32
    %c0_i32_0 = arith.constant 0 : i32
    return %arg0, %arg1, %c0_i32 : i32, i32, i32
  }
}

</mosaic_0001>

<bundles_post_ra>
// kernel: tpu_custom_call.1
= control target key start
LH: loop header
LB: loop body
LE: loop exit
PB: predicated region body
PF: predicated region fallthrough
CT: control target
= control target key end

     0   :  { %s1021_s0 = inlined_call_operand.hbm [shape: bf16[2,4,16,64], index: 0, kind: input, shape index: {}]   ;;  %s1022_s1 = inlined_call_operand.hbm [shape: bf16[64,128], index: 1, kind: input, shape index: {}]   ;;  %s1023_s2 = inlined_call_operand.vmem [shape: f32[1,128], index: 2, kind: input, shape index: {}]   ;;  %s1024_s3 = inlined_call_operand.hbm [shape: f32[2,16,128], index: 3, kind: output, shape index: {}]  }
   0x1   :  { %1026 = sst [smem:[#allocation12_spill]] %s1022_s1 }
   0x2   :  { %8 = vsyncpa [#allocation4], 0 }
   0x3   :  { %10 = vsyncpa [#allocation4 + $0x1], 0 }
   0x4   :  { %11 = vsyncpa [#allocation7], 0 }
   0x5   :  { %12 = vsyncpa [#allocation5], 0 }
   0x6   :  { %14 = vsyncpa [#allocation5 + $0x1], 0  ;;  %s862_s12 = smov 0   ;;  %s864_s13 = smov 0  }
   0x7   :  { %s866_s14 = smov 0   ;;  %s868_s15 = smov 0  }
   0x8   :  { %s870_s16 = smov 0   ;;  %s872_s17 = smov 0  }
   0x9 LB: > { %s536_s18 = sadd.s32 4294967295, %s835_s17   ;;  %s537_s19 = sadd.s32 4294967294, %s835_s17   ;;  %s835_s17 = sphi %s872_s17, %s20_s17   ;;  %s831_s16 = sphi %s870_s16, %s1040_s16   ;;  %s827_s15 = sphi %s868_s15, %s1039_s15   ;;  %s823_s14 = sphi %s866_s14, %s1038_s14   ;;  %s819_s13 = sphi %s864_s13, %s1037_s13   ;;  %s815_s12 = sphi %s862_s12, %s1036_s12  }
   0xa   : > { %p63_p0 = scmp.ne.s32.totalorder %s819_s13, %s815_s12  ;;  %p896_p1 = scmp.eq.s32.totalorder %s536_s18, 0 }
   0xb   : > { %p900_p2 = scmp.eq.s32.totalorder %s536_s18, 1  ;;  %p142_p3 = scmp.eq.s32.totalorder %s537_s19, 1 }
   0xc   : > { %p906_p4 = por %p896_p1, %p63_p0  ;;  %p538_p5 = scmp.ge.s32.totalorder %s835_s17, 1 }
   0xd   : > { %p911_p6 = por %p142_p3, %p63_p0  ;;  %p149_p7 = scmp.lt.s32.totalorder %s835_s17, 3 }
   0xe   : > { %s1031_s1 = sld [smem:[#allocation12_spill]]  ;;  %s837_s28 = smov [#allocation6]  }
   0xf   : > { %p919_p8 = pnand %p538_p5, %p149_p7  ;;  %s165_s29 = sshll.u32 %s837_s28, 4  ;;  %s166_s29 = int_to_ptr.vmem [resolvable:$true] %s165_s29 }
  0x10   : > { %p540_p11 = scmp.ge.s32.totalorder %s835_s17, 2  ;;  %s1025_s30 = smov 64  }
  0x11   : > { %p619_p9 = pneg %p919_p8  ;;  %s839_s4 = smov 4  }
  0x12   : > { %s39_s5 = sadd.s32 1, %s831_s16  ;;  %s50_s6 = sadd.s32 1, %s823_s14 }
  0x13   : > { %p620_p10 = pnand %p619_p9, %p896_p1  ;;  %p41_p12 = scmp.ge.s32.totalorder %s39_s5, 2 }
  0x14   : > { %s163_s26 = sshll.u32 %s1031_s1, 4  ;;  %p57_p13 = scmp.ne.s32.totalorder %s823_s14, %s819_s13  ;;  %s164_s26 = int_to_ptr.hbm [resolvable:$true] %s163_s26 }
  0x15   : > { %622 = dma.hbm_to_vmem [thread:$0]  (!%p620_p10), %s164_s26, 512, %s166_s29, [#allocation7], %s1025_s30, %s1025_s30, %s839_s4  }
  0x16   : > { %p58_p0 = scmp.eq.s32.totalorder %s835_s17, 0  ;;  %s1042_s5 = smov (%p41_p12, %s39_s5), 0 }
  0x17   : > { %p944_p5 = por %p900_p2, %p57_p13  ;;  %s43_s9 = ssub.s32 %s831_s16, %s1042_s5 }
  0x18   : > { %p938_p3 = por %p58_p0, %p57_p13  ;;  %p632_p7 = scmp.lt.s32.totalorder %s835_s17, 2 }
  0x19   : > { %p48_p9 = scmp.eq.s32.totalorder %s43_s9, 0  ;;  %s182_s10 = sand.u32 1, %s823_s14  }
  0x1a   : > { %s541_s11 = sshll.u32 %s182_s10, 5  ;;  %s589_s19 = sshll.u32 %s831_s16, 5 }
  0x1b   : > { %s953_s18 = scalar_select %p48_p9, %s823_s14, %s50_s6  }
  0x1c   : > { %s194_s26 = scalar_lea.hbm %s1021_s0, %s589_s19  ;;  %s186_s28 = scalar_lea.vmem [#allocation3], %s541_s11 }
  0x1d   : > { %s197_s29 = sshll.u32 %s186_s28, 4  ;;  %s195_s21 = sshll.u32 %s194_s26, 4  ;;  %s198_s29 = int_to_ptr.vmem [resolvable:$true] %s197_s29  ;;  %s196_s21 = int_to_ptr.hbm [resolvable:$true] %s195_s21 }
  0x1e   : > { %p624_p2 = pnand %p632_p7, %p938_p3  ;;  %s183_s30 = scalar_lea.sflag [#allocation4], %s182_s10 }
  0x1f   : > { %s1035_s1 = smov 64   ;;  %209 = sbr.rel (%p919_p8) target bundleno = 210 (0xd2), region = 32 }
  0x20   : > { %626 = dma.hbm_to_vmem [thread:$0]  (!%p624_p2), %s196_s21, 512, %s198_s29, %s183_s30, %s1035_s1, %s1035_s1, %s839_s4  }
  0x21   : > { %s967_s6 = sand.u32 (!%p919_p8), 1, %s819_s13  }
  0x22   : > { %s545_s9 = sshll.u32 (!%p919_p8), %s967_s6, 5  ;;  %s212_s11 = scalar_lea.sflag (!%p919_p8), [#allocation4], %s967_s6 }
  0x23   : > { %s215_s19 = scalar_lea.vmem (!%p919_p8), [#allocation3], %s545_s9 }
  0x24   : > { %802 = dma.done.wait (%p906_p4), %s212_s11, 512  }
  0x25   : > { %804 = vsyncadd (%p906_p4), %s212_s11, 4294966784 }
  0x26   : > { %806 = dma.done.wait (%p896_p1), [#allocation7], 512  }
  0x27   : > { %808 = vsyncadd (%p896_p1), [#allocation7], 4294966784  ;;  %v597_v0 = vld [vmem:[#allocation6 + $0x18] sm:$0xff]  ;;  %v596_v1 = vld [vmem:[#allocation6 + $0x10] sm:$0xff]  ;;  %vm328_vm0 = vcmask 523264   ;;  %s547_s22 = sshll.u32 %s967_s6, 4 }
  0x28   : > { %345 = vmatpush.bf16.msra.mxu0 %v597_v0  ;;  %599 = vmatpush.bf16.msra.mxu1 %v597_v0  ;;  %v595_v2 = vld [vmem:[#allocation6 + $0x8] sm:$0xff]  ;;  %v594_v3 = vld [vmem:[#allocation6] sm:$0xff]  ;;  %v592_v6 = vld [vmem:[%s215_s19 + $0x10] sm:$0xff]  ;;  %s598_s27 = sshll.u32 %s827_s15, 4  ;;  %s243_s10 = scalar_lea.vmem [#allocation8], %s547_s22 }
  0x29   : > { %600 = vmatpush.bf16.msra.mxu2 %v597_v0  ;;  %601 = vmatpush.bf16.msra.mxu3 %v597_v0  ;;  %v590_v4 = vld [vmem:[%s215_s19] sm:$0xff]  ;;  %v591_v5 = vld [vmem:[%s215_s19 + $0x8] sm:$0xff]  ;;  %v593_v7 = vld [vmem:[%s215_s19 + $0x18] sm:$0xff]  ;;  %s429_s7 = scalar_lea.hbm %s1024_s3, %s598_s27  ;;  %s430_s24 = sshll.u32 %s243_s10, 4  ;;  %s431_s24 = int_to_ptr.vmem [resolvable:$true] %s430_s24 }
  0x2a   : > { %v688_v14 = vld [vmem:[%s1023_s2] ss:$0 sm:$0xff]  ;;  %s432_s25 = sshll.u32 %s429_s7, 4  ;;  %s416_s15 = scalar_lea.sflag [#allocation5], %s967_s6  ;;  %s433_s25 = int_to_ptr.hbm [resolvable:$true] %s432_s25 }
  0x2b   : > { %s763_s26 = sshra.s32 %s433_s25, 4  ;;  %s769_s9 = scalar_lea.hbm %s1024_s3, 32  ;;  %s764_s26 = int_to_ptr.hbm [resolvable:$true] %s763_s26 }
  0x2c   : > { %346 = vmatpush.bf16.msra.mxu0 %v596_v1  ;;  %602 = vmatpush.bf16.msra.mxu1 %v596_v1  ;;  %s765_s28 = scalar_lea.hbm %s764_s26, 16  ;;  %p770_p10 = scmp.lt.s32.totalorder %s764_s26, %s1024_s3 }
  0x2d   : > { %603 = vmatpush.bf16.msra.mxu2 %v596_v1  ;;  %604 = vmatpush.bf16.msra.mxu3 %v596_v1  ;;  %p766_p1 = scmp.ne.s32.totalorder %s764_s26, %s765_s28  ;;  %p771_p12 = scmp.lt.s32.totalorder %s769_s9, %s765_s28 }
  0x2f   : > { %p767_p4 = pnand %p766_p1, %p944_p5  ;;  %p772_p13 = por %p771_p12, %p770_p10 }
  0x30   : > { %347 = vmatpush.bf16.msra.mxu0 %v595_v2  ;;  %605 = vmatpush.bf16.msra.mxu1 %v595_v2 }
  0x31   : > { %606 = vmatpush.bf16.msra.mxu2 %v595_v2  ;;  %607 = vmatpush.bf16.msra.mxu3 %v595_v2  ;;  %p768_p8 = pneg %p767_p4 }
  0x33   : > { %p773_p0 = pnand %p772_p13, %p768_p8 }
  0x34   : > { %348 = vmatpush.bf16.msra.mxu0 %v594_v3  ;;  %608 = vmatpush.bf16.msra.mxu1 %v594_v3 }
  0x35   : > { %609 = vmatpush.bf16.msra.mxu2 %v594_v3  ;;  %610 = vmatpush.bf16.msra.mxu3 %v594_v3 }
  0x37   : > { %580 = vmatmul.msk.bf16.vlgmr.msra.gmra.mxu0 %vm328_vm0, %v590_v4  ;;  %581 = vmatmul.msk.bf16.vlgmr.msra.gmra.mxu1 %vm328_vm0, %v591_v5 }
  0x38   : > { %582 = vmatmul.msk.bf16.vlgmr.msra.gmra.mxu2 %vm328_vm0, %v592_v6  ;;  %583 = vmatmul.msk.bf16.vlgmr.msra.gmra.mxu3 %vm328_vm0, %v593_v7 }
  0xb4   : > { %v350_v8 = vpop.f32.mrf.mxu0  ;;  %v355_v9 = vpop.f32.mrf.mxu1 }
  0xb5   : > { %v397_v10 = vmax.f32 %v350_v8, %v355_v9 }
  0xbb   : > { %v360_v11 = vpop.f32.mrf.mxu2  ;;  %v365_v12 = vpop.f32.mrf.mxu3 }
  0xbc   : > { %v399_v13 = vmax.f32 %v360_v11, %v365_v12  ;;  %v352_v17 = vpop.f32.mrf.mxu0  ;;  %v357_v18 = vpop.f32.mrf.mxu1 }
  0xbd   : > { %v398_v23 = vmax.f32 %v352_v17, %v357_v18 }
  0xbe   : > { %v401_v15 = vmax.f32 %v397_v10, %v399_v13 }
  0xc0   : > { %v407_v16 = vadd.f32 %v688_v14, %v401_v15 }
  0xc2   : > { %v409_v19 = vmul.f32 0.2, %v407_v16 }
  0xc3   : > { %v362_v20 = vpop.f32.mrf.mxu2  ;;  %v367_v21 = vpop.f32.mrf.mxu3 }
  0xc4   : > { %v411_v22 = vmax.f32 %v407_v16, %v409_v19  ;;  %v400_v24 = vmax.f32 %v362_v20, %v367_v21 }
  0xc6   : > { %413 = vst [vmem:[%s243_s10] sm:$0xff] %v411_v22  ;;  %v402_v25 = vmax.f32 %v398_v23, %v400_v24 }
  0xc8   : > { %v408_v26 = vadd.f32 %v688_v14, %v402_v25 }
  0xca   : > { %v410_v27 = vmul.f32 0.2, %v408_v26 }
  0xcc   : > { %v412_v28 = vmax.f32 %v408_v26, %v410_v27 }
  0xce   : > { %414 = vst [vmem:[%s243_s10 + $0x8] sm:$0xff] %v412_v28 }
  0xcf   : > { %776 = shalt.err (!%p773_p0)
}
  0xd0   : > { %s840_s6 = smov 128   ;;  %s841_s1 = smov 8  }
  0xd1   : > { %617 = dma.vmem_to_hbm [thread:$0]  (%p944_p5), %s431_s24, 256, %s433_s25, %s416_s15, %s840_s6, %s840_s6, %s841_s1  }
  0xd2 PF: > { %s447_s20 = sand.u32 1, %s815_s12   ;;  %p628_p3 = pnand %p540_p11, %p911_p6 }
  0xd3   : > { %s448_s22 = scalar_lea.sflag [#allocation5], %s447_s20 }
  0xd4   : > { %p629_p7 = pneg %p628_p3 }
  0xd6   : > { %810 = dma.done.wait (%p629_p7), %s448_s22, 256  }
  0xd7   : > { %812 = vsyncadd (%p629_p7), %s448_s22, 4294967040  ;;  %s20_s17 = sadd.s32 1, %s835_s17   ;;  %s1036_s12 = smov %s819_s13 }
  0xd8   : > { %p17_p9 = scmp.ge.s32.totalorder %s20_s17, 4   ;;  %s1037_s13 = smov %s823_s14 }
  0xd9   : > { %s1038_s14 = smov %s953_s18  ;;  %s1039_s15 = smov %s831_s16 }
  0xda   : > { %s1040_s16 = smov %s1042_s5  ;;  %19 = sbr.rel (!%p17_p9) target bundleno = 9 (0x9), region = 90 }
  0xdf   :  { %454 = vsyncpa [#allocation4], 1 }
  0xe0   :  { %456 = vsyncpa [#allocation4 + $0x1], 1 }
  0xe1   :  { %457 = vsyncpa [#allocation7], 1 }
  0xe2   :  { %458 = vsyncpa [#allocation5], 1 }
  0xe3   :  { %460 = vsyncpa [#allocation5 + $0x1], 1 }

// kernel: tpu_custom_call.1
= control target key start
LH: loop header
LB: loop body
LE: loop exit
PB: predicated region body
PF: predicated region fallthrough
CT: control target
= control target key end

     0   :  { %s1021_s0 = inlined_call_operand.hbm [shape: bf16[2,4,16,64], index: 0, kind: input, shape index: {}]   ;;  %s1022_s1 = inlined_call_operand.hbm [shape: bf16[64,128], index: 1, kind: input, shape index: {}]   ;;  %s1023_s2 = inlined_call_operand.vmem [shape: f32[1,128], index: 2, kind: input, shape index: {}]   ;;  %s1024_s3 = inlined_call_operand.hbm [shape: f32[2,16,128], index: 3, kind: output, shape index: {}]  }
   0x1   :  { %1026 = sst [smem:[#allocation12_spill]] %s1022_s1 }
   0x2   :  { %8 = vsyncpa [#allocation4], 0 }
   0x3   :  { %10 = vsyncpa [#allocation4 + $0x1], 0 }
   0x4   :  { %11 = vsyncpa [#allocation7], 0 }
   0x5   :  { %12 = vsyncpa [#allocation5], 0 }
   0x6   :  { %14 = vsyncpa [#allocation5 + $0x1], 0  ;;  %s862_s12 = smov 0   ;;  %s864_s13 = smov 0  }
   0x7   :  { %s866_s14 = smov 0   ;;  %s868_s15 = smov 0  }
   0x8   :  { %s870_s16 = smov 0   ;;  %s872_s17 = smov 0  }
   0x9 LB: > { %s536_s18 = sadd.s32 4294967295, %s835_s17   ;;  %s537_s19 = sadd.s32 4294967294, %s835_s17   ;;  %s835_s17 = sphi %s872_s17, %s20_s17   ;;  %s831_s16 = sphi %s870_s16, %s1040_s16   ;;  %s827_s15 = sphi %s868_s15, %s1039_s15   ;;  %s823_s14 = sphi %s866_s14, %s1038_s14   ;;  %s819_s13 = sphi %s864_s13, %s1037_s13   ;;  %s815_s12 = sphi %s862_s12, %s1036_s12  }
   0xa   : > { %p63_p0 = scmp.ne.s32.totalorder %s819_s13, %s815_s12  ;;  %p896_p1 = scmp.eq.s32.totalorder %s536_s18, 0 }
   0xb   : > { %p900_p2 = scmp.eq.s32.totalorder %s536_s18, 1  ;;  %p142_p3 = scmp.eq.s32.totalorder %s537_s19, 1 }
   0xc   : > { %p906_p4 = por %p896_p1, %p63_p0  ;;  %p538_p5 = scmp.ge.s32.totalorder %s835_s17, 1 }
   0xd   : > { %p911_p6 = por %p142_p3, %p63_p0  ;;  %p149_p7 = scmp.lt.s32.totalorder %s835_s17, 3 }
   0xe   : > { %s1031_s1 = sld [smem:[#allocation12_spill]]  ;;  %s837_s28 = smov [#allocation6]  }
   0xf   : > { %p919_p8 = pnand %p538_p5, %p149_p7  ;;  %s165_s29 = sshll.u32 %s837_s28, 4  ;;  %s166_s29 = int_to_ptr.vmem [resolvable:$true] %s165_s29 }
  0x10   : > { %p540_p11 = scmp.ge.s32.totalorder %s835_s17, 2  ;;  %s1025_s30 = smov 64  }
  0x11   : > { %p619_p9 = pneg %p919_p8  ;;  %s839_s4 = smov 4  }
  0x12   : > { %s39_s5 = sadd.s32 1, %s831_s16  ;;  %s50_s6 = sadd.s32 1, %s823_s14 }
  0x13   : > { %p620_p10 = pnand %p619_p9, %p896_p1  ;;  %p41_p12 = scmp.ge.s32.totalorder %s39_s5, 2 }
  0x14   : > { %s163_s26 = sshll.u32 %s1031_s1, 4  ;;  %p57_p13 = scmp.ne.s32.totalorder %s823_s14, %s819_s13  ;;  %s164_s26 = int_to_ptr.hbm [resolvable:$true] %s163_s26 }
  0x15   : > { %622 = dma.hbm_to_vmem [thread:$0]  (!%p620_p10), %s164_s26, 512, %s166_s29, [#allocation7], %s1025_s30, %s1025_s30, %s839_s4  }
  0x16   : > { %p58_p0 = scmp.eq.s32.totalorder %s835_s17, 0  ;;  %s1042_s5 = smov (%p41_p12, %s39_s5), 0 }
  0x17   : > { %p944_p5 = por %p900_p2, %p57_p13  ;;  %s43_s9 = ssub.s32 %s831_s16, %s1042_s5 }
  0x18   : > { %p938_p3 = por %p58_p0, %p57_p13  ;;  %p632_p7 = scmp.lt.s32.totalorder %s835_s17, 2 }
  0x19   : > { %p48_p9 = scmp.eq.s32.totalorder %s43_s9, 0  ;;  %s182_s10 = sand.u32 1, %s823_s14  }
  0x1a   : > { %s541_s11 = sshll.u32 %s182_s10, 5  ;;  %s589_s19 = sshll.u32 %s831_s16, 5 }
  0x1b   : > { %s953_s18 = scalar_select %p48_p9, %s823_s14, %s50_s6  }
  0x1c   : > { %s194_s26 = scalar_lea.hbm %s1021_s0, %s589_s19  ;;  %s186_s28 = scalar_lea.vmem [#allocation3], %s541_s11 }
  0x1d   : > { %s197_s29 = sshll.u32 %s186_s28, 4  ;;  %s195_s21 = sshll.u32 %s194_s26, 4  ;;  %s198_s29 = int_to_ptr.vmem [resolvable:$true] %s197_s29  ;;  %s196_s21 = int_to_ptr.hbm [resolvable:$true] %s195_s21 }
  0x1e   : > { %p624_p2 = pnand %p632_p7, %p938_p3  ;;  %s183_s30 = scalar_lea.sflag [#allocation4], %s182_s10 }
  0x1f   : > { %s1035_s1 = smov 64   ;;  %209 = sbr.rel (%p919_p8) target bundleno = 210 (0xd2), region = 32 }
  0x20   : > { %626 = dma.hbm_to_vmem [thread:$0]  (!%p624_p2), %s196_s21, 512, %s198_s29, %s183_s30, %s1035_s1, %s1035_s1, %s839_s4  }
  0x21   : > { %s967_s6 = sand.u32 (!%p919_p8), 1, %s819_s13  }
  0x22   : > { %s545_s9 = sshll.u32 (!%p919_p8), %s967_s6, 5  ;;  %s212_s11 = scalar_lea.sflag (!%p919_p8), [#allocation4], %s967_s6 }
  0x23   : > { %s215_s19 = scalar_lea.vmem (!%p919_p8), [#allocation3], %s545_s9 }
  0x24   : > { %802 = dma.done.wait (%p906_p4), %s212_s11, 512  }
  0x25   : > { %804 = vsyncadd (%p906_p4), %s212_s11, 4294966784 }
  0x26   : > { %806 = dma.done.wait (%p896_p1), [#allocation7], 512  }
  0x27   : > { %808 = vsyncadd (%p896_p1), [#allocation7], 4294966784  ;;  %v597_v0 = vld [vmem:[#allocation6 + $0x18] sm:$0xff]  ;;  %v596_v1 = vld [vmem:[#allocation6 + $0x10] sm:$0xff]  ;;  %vm328_vm0 = vcmask 523264   ;;  %s547_s22 = sshll.u32 %s967_s6, 4 }
  0x28   : > { %345 = vmatpush.bf16.msra.mxu0 %v597_v0  ;;  %599 = vmatpush.bf16.msra.mxu1 %v597_v0  ;;  %v595_v2 = vld [vmem:[#allocation6 + $0x8] sm:$0xff]  ;;  %v594_v3 = vld [vmem:[#allocation6] sm:$0xff]  ;;  %v592_v6 = vld [vmem:[%s215_s19 + $0x10] sm:$0xff]  ;;  %s598_s27 = sshll.u32 %s827_s15, 4  ;;  %s243_s10 = scalar_lea.vmem [#allocation8], %s547_s22 }
  0x29   : > { %600 = vmatpush.bf16.msra.mxu2 %v597_v0  ;;  %601 = vmatpush.bf16.msra.mxu3 %v597_v0  ;;  %v590_v4 = vld [vmem:[%s215_s19] sm:$0xff]  ;;  %v591_v5 = vld [vmem:[%s215_s19 + $0x8] sm:$0xff]  ;;  %v593_v7 = vld [vmem:[%s215_s19 + $0x18] sm:$0xff]  ;;  %s429_s7 = scalar_lea.hbm %s1024_s3, %s598_s27  ;;  %s430_s24 = sshll.u32 %s243_s10, 4  ;;  %s431_s24 = int_to_ptr.vmem [resolvable:$true] %s430_s24 }
  0x2a   : > { %v688_v14 = vld [vmem:[%s1023_s2] ss:$0 sm:$0xff]  ;;  %s432_s25 = sshll.u32 %s429_s7, 4  ;;  %s416_s15 = scalar_lea.sflag [#allocation5], %s967_s6  ;;  %s433_s25 = int_to_ptr.hbm [resolvable:$true] %s432_s25 }
  0x2b   : > { %s763_s26 = sshra.s32 %s433_s25, 4  ;;  %s769_s9 = scalar_lea.hbm %s1024_s3, 32  ;;  %s764_s26 = int_to_ptr.hbm [resolvable:$true] %s763_s26 }
  0x2c   : > { %346 = vmatpush.bf16.msra.mxu0 %v596_v1  ;;  %602 = vmatpush.bf16.msra.mxu1 %v596_v1  ;;  %s765_s28 = scalar_lea.hbm %s764_s26, 16  ;;  %p770_p10 = scmp.lt.s32.totalorder %s764_s26, %s1024_s3 }
  0x2d   : > { %603 = vmatpush.bf16.msra.mxu2 %v596_v1  ;;  %604 = vmatpush.bf16.msra.mxu3 %v596_v1  ;;  %p766_p1 = scmp.ne.s32.totalorder %s764_s26, %s765_s28  ;;  %p771_p12 = scmp.lt.s32.totalorder %s769_s9, %s765_s28 }
  0x2f   : > { %p767_p4 = pnand %p766_p1, %p944_p5  ;;  %p772_p13 = por %p771_p12, %p770_p10 }
  0x30   : > { %347 = vmatpush.bf16.msra.mxu0 %v595_v2  ;;  %605 = vmatpush.bf16.msra.mxu1 %v595_v2 }
  0x31   : > { %606 = vmatpush.bf16.msra.mxu2 %v595_v2  ;;  %607 = vmatpush.bf16.msra.mxu3 %v595_v2  ;;  %p768_p8 = pneg %p767_p4 }
  0x33   : > { %p773_p0 = pnand %p772_p13, %p768_p8 }
  0x34   : > { %348 = vmatpush.bf16.msra.mxu0 %v594_v3  ;;  %608 = vmatpush.bf16.msra.mxu1 %v594_v3 }
  0x35   : > { %609 = vmatpush.bf16.msra.mxu2 %v594_v3  ;;  %610 = vmatpush.bf16.msra.mxu3 %v594_v3 }
  0x37   : > { %580 = vmatmul.msk.bf16.vlgmr.msra.gmra.mxu0 %vm328_vm0, %v590_v4  ;;  %581 = vmatmul.msk.bf16.vlgmr.msra.gmra.mxu1 %vm328_vm0, %v591_v5 }
  0x38   : > { %582 = vmatmul.msk.bf16.vlgmr.msra.gmra.mxu2 %vm328_vm0, %v592_v6  ;;  %583 = vmatmul.msk.bf16.vlgmr.msra.gmra.mxu3 %vm328_vm0, %v593_v7 }
  0xb4   : > { %v350_v8 = vpop.f32.mrf.mxu0  ;;  %v355_v9 = vpop.f32.mrf.mxu1 }
  0xb5   : > { %v397_v10 = vmax.f32 %v350_v8, %v355_v9 }
  0xbb   : > { %v360_v11 = vpop.f32.mrf.mxu2  ;;  %v365_v12 = vpop.f32.mrf.mxu3 }
  0xbc   : > { %v399_v13 = vmax.f32 %v360_v11, %v365_v12  ;;  %v352_v17 = vpop.f32.mrf.mxu0  ;;  %v357_v18 = vpop.f32.mrf.mxu1 }
  0xbd   : > { %v398_v23 = vmax.f32 %v352_v17, %v357_v18 }
  0xbe   : > { %v401_v15 = vmax.f32 %v397_v10, %v399_v13 }
  0xc0   : > { %v407_v16 = vadd.f32 %v688_v14, %v401_v15 }
  0xc2   : > { %v409_v19 = vmul.f32 0.2, %v407_v16 }
  0xc3   : > { %v362_v20 = vpop.f32.mrf.mxu2  ;;  %v367_v21 = vpop.f32.mrf.mxu3 }
  0xc4   : > { %v411_v22 = vmax.f32 %v407_v16, %v409_v19  ;;  %v400_v24 = vmax.f32 %v362_v20, %v367_v21 }
  0xc6   : > { %413 = vst [vmem:[%s243_s10] sm:$0xff] %v411_v22  ;;  %v402_v25 = vmax.f32 %v398_v23, %v400_v24 }
  0xc8   : > { %v408_v26 = vadd.f32 %v688_v14, %v402_v25 }
  0xca   : > { %v410_v27 = vmul.f32 0.2, %v408_v26 }
  0xcc   : > { %v412_v28 = vmax.f32 %v408_v26, %v410_v27 }
  0xce   : > { %414 = vst [vmem:[%s243_s10 + $0x8] sm:$0xff] %v412_v28 }
  0xcf   : > { %776 = shalt.err (!%p773_p0)
}
  0xd0   : > { %s840_s6 = smov 128   ;;  %s841_s1 = smov 8  }
  0xd1   : > { %617 = dma.vmem_to_hbm [thread:$0]  (%p944_p5), %s431_s24, 256, %s433_s25, %s416_s15, %s840_s6, %s840_s6, %s841_s1  }
  0xd2 PF: > { %s447_s20 = sand.u32 1, %s815_s12   ;;  %p628_p3 = pnand %p540_p11, %p911_p6 }
  0xd3   : > { %s448_s22 = scalar_lea.sflag [#allocation5], %s447_s20 }
  0xd4   : > { %p629_p7 = pneg %p628_p3 }
  0xd6   : > { %810 = dma.done.wait (%p629_p7), %s448_s22, 256  }
  0xd7   : > { %812 = vsyncadd (%p629_p7), %s448_s22, 4294967040  ;;  %s20_s17 = sadd.s32 1, %s835_s17   ;;  %s1036_s12 = smov %s819_s13 }
  0xd8   : > { %p17_p9 = scmp.ge.s32.totalorder %s20_s17, 4   ;;  %s1037_s13 = smov %s823_s14 }
  0xd9   : > { %s1038_s14 = smov %s953_s18  ;;  %s1039_s15 = smov %s831_s16 }
  0xda   : > { %s1040_s16 = smov %s1042_s5  ;;  %19 = sbr.rel (!%p17_p9) target bundleno = 9 (0x9), region = 90 }
  0xdf   :  { %454 = vsyncpa [#allocation4], 1 }
  0xe0   :  { %456 = vsyncpa [#allocation4 + $0x1], 1 }
  0xe1   :  { %457 = vsyncpa [#allocation7], 1 }
  0xe2   :  { %458 = vsyncpa [#allocation5], 1 }
  0xe3   :  { %460 = vsyncpa [#allocation5 + $0x1], 1 }

</bundles_post_ra>
